<compile_context>
chip_gen: v7x
topology: tpu7x:2x2x1
jax: 0.10.0
libtpu: 0.0.40
codegen_flags: <defaults>
</compile_context>

<pallas_src>
import functools

import jax
import jax.numpy as jnp
from jax.experimental import pallas as pl
from jax.experimental.pallas import tpu as pltpu

_INV_SQRT2 = 0.7071067811865476  # 1/sqrt(2), for exact (erf) GELU


def _round_up(x, m):
    return ((x + m - 1) // m) * m


def _intermediate_kernel(x_ref, w_ref, b_ref, o_ref):
    # x_ref: (tm, H) compute dtype; w_ref: (H, tn) compute dtype;
    # b_ref: (1, tn) f32; o_ref: (tm, tn) f32
    y = jnp.dot(x_ref[...], w_ref[...], preferred_element_type=jnp.float32)
    y = y + b_ref[...]
    # Exact (erf-based) GELU, matching HuggingFace ACT2FN["gelu"] / torch.nn.GELU()
    y = 0.5 * y * (1.0 + jax.lax.erf(y * _INV_SQRT2))
    o_ref[...] = y.astype(o_ref.dtype)


@functools.partial(jax.jit, static_argnames=("tile_m", "tile_n", "compute_dtype"))
def roberta_intermediate(hidden_states, weight_t, bias, *,
                         tile_m=256, tile_n=512,
                         compute_dtype=jnp.bfloat16):
    """hidden_states: (B, S, H); weight_t: (H, I); bias: (I,) -> (B, S, I)."""
    B, S, H = hidden_states.shape
    I = weight_t.shape[1]
    M = B * S

    # --- M (row) tile: large & MXU-aligned, but never bigger than padded M ---
    tm = min(tile_m, _round_up(M, 8))      # sublane-aligned (multiple of 8)
    M_pad = _round_up(M, tm)               # pad instead of asserting divisibility

    # --- I (intermediate) tile: lane-dense multiple of 128, or full I -------
    tn = tile_n if (I % tile_n == 0) else I

    x2d = hidden_states.reshape(M, H)
    if M_pad != M:
        x2d = jnp.pad(x2d, ((0, M_pad - M), (0, 0)))

    x2d = x2d.astype(compute_dtype)
    w = weight_t.astype(compute_dtype)
    b2d = bias.reshape(1, I).astype(jnp.float32)

    grid = (M_pad // tm, I // tn)

    out = pl.pallas_call(
        _intermediate_kernel,
        out_shape=jax.ShapeDtypeStruct((M_pad, I), hidden_states.dtype),
        grid_spec=pltpu.PrefetchScalarGridSpec(
            num_scalar_prefetch=0,
            grid=grid,
            in_specs=[
                pl.BlockSpec((tm, H), lambda i, j: (i, 0)),   # activations
                pl.BlockSpec((H, tn), lambda i, j: (0, j)),   # weight slab
                pl.BlockSpec((1, tn), lambda i, j: (0, j)),   # bias slab
            ],
            out_specs=pl.BlockSpec((tm, tn), lambda i, j: (i, j)),
        ),
        compiler_params=pltpu.CompilerParams(
            dimension_semantics=("parallel", "parallel"),
        ),
    )(x2d, w, b2d)

    if M_pad != M:
        out = out[:M]
    return out.reshape(B, S, I)


if __name__ == "__main__":
    # Small config consistent with the module: hidden_size=32, intermediate_size=128
    batch, seq, hidden_size, intermediate_size = 2, 8, 32, 128

    key = jax.random.PRNGKey(0)
    k_x, k_w, k_b = jax.random.split(key, 3)

    hidden_states = jax.random.normal(k_x, (batch, seq, hidden_size), dtype=jnp.float32)
    # nn.Linear weight is (out, in); store transposed as (in, out) for the kernel.
    weight = jax.random.normal(k_w, (intermediate_size, hidden_size), dtype=jnp.float32) * 0.02
    bias = jax.random.normal(k_b, (intermediate_size,), dtype=jnp.float32) * 0.02
    weight_t = weight.T  # (hidden_size, intermediate_size)

    # Reference in plain JAX f32 (exact erf GELU, same as torch.nn.GELU default)
    ref = hidden_states @ weight_t + bias
    ref = 0.5 * ref * (1.0 + jax.lax.erf(ref / jnp.sqrt(2.0)))

    # Default (bf16 MXU path, f32 accumulation) — tolerance appropriate for bf16 inputs.
    out_bf16 = roberta_intermediate(hidden_states, weight_t, bias)
    jax.block_until_ready(out_bf16)
    assert out_bf16.shape == (batch, seq, intermediate_size)
    assert jnp.allclose(out_bf16, ref, atol=2e-2, rtol=2e-2)

    # Full-f32 compute path — tight tolerance check of the kernel structure.
    out_f32 = roberta_intermediate(hidden_states, weight_t, bias,
                                   compute_dtype=jnp.float32)
    jax.block_until_ready(out_f32)
    assert jnp.allclose(out_f32, ref, atol=1e-5, rtol=1e-5)

    print("KERNEL_OK")
</pallas_src>

<mosaic_0001>
module attributes {stable_mosaic.version = 11 : i64} {
  func.func @_intermediate_kernel(%arg0: i32, %arg1: i32, %arg2: memref<16x32xbf16, #tpu.memory_space<vmem>>, %arg3: memref<32x128xbf16, #tpu.memory_space<vmem>>, %arg4: memref<1x128xf32, #tpu.memory_space<vmem>>, %arg5: memref<16x128xf32, #tpu.memory_space<vmem>>) attributes {dimension_semantics = [#tpu.dimension_semantics<parallel>, #tpu.dimension_semantics<parallel>], iteration_bounds = array<i64: 1, 1>, scalar_prefetch = 0 : i64, scratch_operands = 0 : i64, tpu.core_type = #tpu.core_type<tc>, window_params = [{transform_indices = @transform_0, window_bounds = array<i64: 16, 32>}, {transform_indices = @transform_1, window_bounds = array<i64: 32, 128>}, {transform_indices = @transform_2, window_bounds = array<i64: 1, 128>}, {transform_indices = @transform_3, window_bounds = array<i64: 16, 128>}]} {
    %c0 = arith.constant 0 : index
    %c0_0 = arith.constant 0 : index
    %0 = vector.load %arg2[%c0, %c0_0] : memref<16x32xbf16, #tpu.memory_space<vmem>>, vector<16x32xbf16>
    %c0_1 = arith.constant 0 : index
    %c0_2 = arith.constant 0 : index
    %1 = vector.load %arg3[%c0_1, %c0_2] : memref<32x128xbf16, #tpu.memory_space<vmem>>, vector<32x128xbf16>
    %cst = arith.constant dense<0.000000e+00> : vector<16x128xf32>
    %2 = tpu.matmul %0, %1, %cst {dimension_numbers = #tpu.dot_dimension_numbers<[1], [0], [0], [1], [0, 0, 1, 1], [], []>} : vector<16x32xbf16>, vector<32x128xbf16>, vector<16x128xf32> -> vector<16x128xf32>
    %c0_3 = arith.constant 0 : index
    %c0_4 = arith.constant 0 : index
    %3 = vector.load %arg4[%c0_3, %c0_4] : memref<1x128xf32, #tpu.memory_space<vmem>>, vector<1x128xf32>
    %4 = vector.broadcast %3 : vector<1x128xf32> to vector<16x128xf32>
    %5 = arith.addf %2, %4 : vector<16x128xf32>
    %cst_5 = arith.constant 5.000000e-01 : f32
    %6 = vector.broadcast %cst_5 : f32 to vector<16x128xf32>
    %7 = arith.mulf %6, %5 : vector<16x128xf32>
    %cst_6 = arith.constant 0.707106769 : f32
    %8 = vector.broadcast %cst_6 : f32 to vector<16x128xf32>
    %9 = arith.mulf %5, %8 : vector<16x128xf32>
    %10 = math.erf %9 : vector<16x128xf32>
    %cst_7 = arith.constant 1.000000e+00 : f32
    %11 = vector.broadcast %cst_7 : f32 to vector<16x128xf32>
    %12 = arith.addf %11, %10 : vector<16x128xf32>
    %13 = arith.mulf %7, %12 : vector<16x128xf32>
    %c0_8 = arith.constant 0 : index
    %c0_9 = arith.constant 0 : index
    %14 = vector.load %arg5[%c0_8, %c0_9] : memref<16x128xf32, #tpu.memory_space<vmem>>, vector<16x128xf32>
    tpu.vector_store %arg5[%c0_8, %c0_9], %13 {strides = array<i32>} : memref<16x128xf32, #tpu.memory_space<vmem>>, vector<16x128xf32>,
    return
  }
  func.func @transform_0(%arg0: i32, %arg1: i32) -> (i32, i32) {
    %c0_i32 = arith.constant 0 : i32
    %c0_i32_0 = arith.constant 0 : i32
    return %arg0, %c0_i32 : i32, i32
  }
  func.func @transform_1(%arg0: i32, %arg1: i32) -> (i32, i32) {
    %c0_i32 = arith.constant 0 : i32
    %c0_i32_0 = arith.constant 0 : i32
    return %c0_i32, %arg1 : i32, i32
  }
  func.func @transform_2(%arg0: i32, %arg1: i32) -> (i32, i32) {
    %c0_i32 = arith.constant 0 : i32
    %c0_i32_0 = arith.constant 0 : i32
    return %c0_i32, %arg1 : i32, i32
  }
  func.func @transform_3(%arg0: i32, %arg1: i32) -> (i32, i32) {
    %c0_i32 = arith.constant 0 : i32
    return %arg0, %arg1 : i32, i32
  }
}

</mosaic_0001>

<bundles_post_ra>
// kernel: roberta_intermediate.1
= control target key start
LH: loop header
LB: loop body
LE: loop exit
PB: predicated region body
PF: predicated region fallthrough
CT: control target
= control target key end

     0   :  { %v171_v1 = vmov 0.0   ;;  %vm172_vm0 = vmmov 0   ;;  %s220_s0 = inlined_call_operand.vmem [shape: bf16[16,32], index: 0, kind: input, shape index: {}]   ;;  %s221_s1 = inlined_call_operand.vmem [shape: bf16[32,128], index: 1, kind: input, shape index: {}]   ;;  %s222_s2 = inlined_call_operand.vmem [shape: f32[1,128], index: 2, kind: input, shape index: {}]   ;;  %s223_s3 = inlined_call_operand.hbm [shape: f32[16,128], index: 3, kind: output, shape index: {}]  }
   0x1   :  { %v140_v0 = vld [vmem:[%s221_s1] sm:$0xff]   ;;  %127 = vmatprep.subr.bf16.mxu0 %v171_v1  ;;  %v141_v2 = vld [vmem:[%s221_s1 + $0x8] sm:$0xff]   ;;  %131 = vmatprep.mubr.msk.bf16.mxu0 %vm172_vm0, %v171_v1 }
   0x2   :  { %128 = vmatpush3.bf16.msra.mxu0 %v140_v0 }
   0x3   :  { %129 = vmatprep.subr.bf16.mxu0 %v171_v1 }
   0x4   :  { %8 = vsyncpa [#allocation3], 0  ;;  %v142_v3 = vld [vmem:[%s220_s0] sm:$0xff]   ;;  %vm46_vm1 = vcmask 261120   ;;  %s173_s0 = smov [#allocation2]  }
   0x5   :  { %v119_v4 = vld [vmem:[%s222_s2] ss:$0 sm:$0xff]  ;;  %s108_s1 = sshll.u32 %s173_s0, 4  ;;  %s109_s1 = int_to_ptr.vmem [resolvable:$true] %s108_s1 }
   0x6   :  { %130 = vmatpush3.bf16.msra.mxu0 %v141_v2  ;;  %s147_s2 = scalar_lea.vmem %s109_s1, 256  ;;  %p152_p1 = scmp.lt.s32.totalorder %s109_s1, %s109_s1 }
   0x7   :  { %p148_p0 = scmp.ne.s32.totalorder %s109_s1, %s147_s2  ;;  %p153_p2 = scmp.lt.s32.totalorder %s147_s2, %s147_s2 }
   0x9   :  { %132 = vmatmul.mubr.msk.bf16.vlgmr.msra.gmra.mrb[0].mxu0 %vm46_vm1, %v142_v3  ;;  %p154_p3 = por %p153_p2, %p152_p1 }
   0xb   :  { %p155_p4 = pnand %p154_p3, %p148_p0 }
  0xdc   :  { %v84_v5 = vpop.f32.mrb[0].mxu0 }
  0xdd   :  { %v85_v6 = vadd.f32 %v119_v4, %v84_v5  ;;  %v133_v7 = vpop.f32.mrb[1].mxu0 }
  0xde   :  { %v87_v8 = vpop.f32.mrb[2].mxu0 }
  0xdf   :  { %v93_v9 = vmul.f32 0.70710677, %v85_v6  ;;  %v88_v10 = vadd.f32 %v119_v4, %v87_v8  ;;  %v134_v11 = vpop.f32.mrb[3].mxu0  ;;  %v91_v14 = vmul.f32 0.5, %v85_v6 }
  0xe1   :  { %143 = verf.f32 %v93_v9  ;;  %v94_v12 = vmul.f32 0.70710677, %v88_v10  ;;  %v92_v18 = vmul.f32 0.5, %v88_v10 }
  0xe3   :  { %145 = verf.f32 %v94_v12 }
  0xeb   :  { %v144_v13 = vpop.eup %143 }
  0xec   :  { %v97_v15 = vadd.f32 1.0, %v144_v13 }
  0xed   :  { %v146_v16 = vpop.eup %145 }
  0xee   :  { %v99_v17 = vmul.f32 %v97_v15, %v91_v14  ;;  %v98_v19 = vadd.f32 1.0, %v146_v16 }
  0xf0   :  { %101 = vst [vmem:[#allocation2] sm:$0xff] %v99_v17  ;;  %v100_v20 = vmul.f32 %v98_v19, %v92_v18 }
  0xf2   :  { %102 = vst [vmem:[#allocation2 + $0x8] sm:$0xff] %v100_v20 }
  0xf3   :  { %158 = shalt.err (!%p155_p4)
}
  0xf4   :  { %s159_s22 = scalar_lea.hbm %s223_s3, 256 }
  0xf5   :  { %p160_p5 = scmp.ne.s32.totalorder %s223_s3, %s159_s22  ;;  %p163_p6 = scmp.lt.u32.totalorder %s159_s22, %s223_s3 }
  0xf7   :  { %p165_p7 = pnand %p163_p6, %p160_p5 }
  0xf9   :  { %168 = shalt.err (!%p165_p7)
}
  0xfa   :  { %s174_s27 = smov 128   ;;  %s175_s28 = smov 8  }
  0xfb   :  { %114 = dma.vmem_to_hbm [thread:$0]  %s109_s1, 256, %s223_s3, [#allocation3], %s174_s27, %s174_s27, %s175_s28  }
  0xfc   :  { %169 = dma.done.wait [#allocation3], 256  }
  0xfd   :  { %170 = vsyncadd [#allocation3], 4294967040 }
  0xfe   :  { %118 = vsyncpa [#allocation3], 1 }

</bundles_post_ra>
